<compile_context>
chip_gen: v5e
topology: v5e:2x2
jax: 0.10.0
libtpu: 0.0.40
codegen_flags: <defaults>
</compile_context>

<pallas_src>
import functools

import jax
import jax.numpy as jnp
from jax.experimental import pallas as pl
from jax.experimental.pallas import tpu as pltpu


def _round_up(x, m):
    return ((x + m - 1) // m) * m


def _default_relu_bf16():
    # bf16 VALU exists on v6e/v7x; v5e (and older gens) keep the f32 path.
    try:
        kind = jax.devices()[0].device_kind.lower()
    except Exception:
        return True
    return not any(v in kind for v in ("v2", "v3", "v4", "v5"))


def _leaky_relu_to_bf16(h, relu_bf16):
    """LeakyReLU(0.2) + cast to bf16 for the next MXU dot."""
    if relu_bf16:
        hb = h.astype(jnp.bfloat16)
        return jnp.where(hb > 0, hb, hb * 0.2)
    return jnp.where(h > 0, h, h * 0.2).astype(jnp.bfloat16)


def disc1_mlp_kernel(ximg_ref, lab_ref, w1i_ref, w1e_ref, w2_ref, w3_ref,
                     w4_ref, out_ref, *, relu_bf16):
    # ximg: (TB, data_dim) f32      lab: (TB, 1) int32
    # w1i:  (data_dim, H4P) bf16    w1e: (NCP, H4P) bf16  (= emb_table @ w1_emb)
    # w2:   (H4P, H4P)   bf16       w3:  (H4P, H2P) bf16  w4: (8, H2P) bf16
    # out:  (1, TB) f32  (lane-major validity row)
    tb = ximg_ref.shape[0]
    ncp = w1e_ref.shape[0]

    # Layer 1, image half: cast at the dot boundary (rides free VPU slots).
    x = ximg_ref[...].astype(jnp.bfloat16)
    h = jnp.dot(x, w1i_ref[...], preferred_element_type=jnp.float32)

    # Layer 1, label half: one_hot(labels) @ (emb_table @ w1_emb) is exactly
    # the embedding lookup fused into the layer-1 accumulate (MXU row-select).
    classes = jax.lax.broadcasted_iota(jnp.int32, (tb, ncp), 1)
    onehot = (lab_ref[...] == classes).astype(jnp.bfloat16)       # (TB, NCP)
    h = h + jnp.dot(onehot, w1e_ref[...], preferred_element_type=jnp.float32)
    h = _leaky_relu_to_bf16(h, relu_bf16)

    # Layer 2
    h = jnp.dot(h, w2_ref[...], preferred_element_type=jnp.float32)
    h = _leaky_relu_to_bf16(h, relu_bf16)

    # Layer 3
    h = jnp.dot(h, w3_ref[...], preferred_element_type=jnp.float32)
    h = _leaky_relu_to_bf16(h, relu_bf16)                          # (TB, H2P)

    # Layer 4: w4 @ h^T -> lane-major (8, TB); row 0 is the validity.
    res = jax.lax.dot_general(
        w4_ref[...], h,
        dimension_numbers=(((1,), (1,)), ((), ())),
        preferred_element_type=jnp.float32)
    out_ref[...] = res[0:1, :]


def _invariant_weight_spec(shape):
    """Grid-invariant weight block; single-buffered when supported (halves the
    weight VMEM footprint, which matters on v7x's 64 MiB at real hidden_dim)."""
    index_map = lambda i: (0, 0)
    try:
        return pl.BlockSpec(shape, index_map, pipeline_mode=pl.Buffered(1))
    except Exception:
        return pl.BlockSpec(shape, index_map)


def prepare_params(params):
    """One-time packing of Discriminator1 params for the kernel (bf16 + lane
    padding + folding the embedding table into layer 1).  Call once, reuse."""
    emb_table, w1, w2, w3, w4 = params
    n_classes, emb_dim = emb_table.shape
    in_dim, h4 = w1.shape
    data_dim = in_dim - emb_dim
    h2 = w3.shape[1]

    h4p = _round_up(h4, 128)
    h2p = _round_up(h2, 128)
    ncp = _round_up(n_classes, 128)
    bf = jnp.bfloat16

    w1_img = jnp.pad(w1[:data_dim], ((0, 0), (0, h4p - h4))).astype(bf)
    # one_hot(labels) @ w1e_eff == label_embedding(labels) @ w1_emb
    w1e_eff = jnp.dot(emb_table, w1[data_dim:],
                      preferred_element_type=jnp.float32)          # (nc, h4)
    w1e_eff = jnp.pad(w1e_eff,
                      ((0, ncp - n_classes), (0, h4p - h4))).astype(bf)
    w2p = jnp.pad(w2, ((0, h4p - h4), (0, h4p - h4))).astype(bf)
    w3p = jnp.pad(w3, ((0, h4p - h4), (0, h2p - h2))).astype(bf)
    w4p = jnp.pad(w4.reshape(1, h2), ((0, 7), (0, h2p - h2))).astype(bf)  # (8, H2P)

    meta = dict(data_dim=data_dim, n_classes=n_classes,
                h4p=h4p, h2p=h2p, ncp=ncp)
    return (w1_img, w1e_eff, w2p, w3p, w4p), meta


def discriminator1_forward(img, labels, prepared, *, tile_b=None, relu_bf16=None):
    """img: [B, C, H, W] float32, labels: [B] int -> validity [B, 1] float32."""
    (w1_img, w1e_eff, w2p, w3p, w4p), meta = prepared
    B = img.shape[0]
    data_dim, h4p, h2p, ncp = meta["data_dim"], meta["h4p"], meta["h2p"], meta["ncp"]

    img_flat = img.reshape(B, -1).astype(jnp.float32)   # bf16 cast happens in-kernel
    assert img_flat.shape[1] == data_dim
    lab = labels.astype(jnp.int32).reshape(B, 1)

    if relu_bf16 is None:
        relu_bf16 = _default_relu_bf16()

    # Batch tiling: multiple of 128 (lane-packed output) and ~B/4 so that
    # grid_b >= 2 for medium batches (pipelining + both v7x TensorCores busy).
    if tile_b is None:
        tile_b = min(512, _round_up(max(-(-B // 4), 1), 128))
    assert tile_b % 128 == 0, "tile_b must be a multiple of 128"
    Bp = _round_up(B, tile_b)
    if Bp != B:
        pad = Bp - B
        img_flat = jnp.pad(img_flat, ((0, pad), (0, 0)))
        lab = jnp.pad(lab, ((0, pad), (0, 0)))
    grid_b = Bp // tile_b

    # VMEM budget: double-buffered I/O tiles, single-buffered weights,
    # activation scratch; clamp to ~85% of the chip's actual VMEM (v7x-safe).
    weight_bytes = 2 * (data_dim * h4p + ncp * h4p + h4p * h4p + h4p * h2p + 8 * h2p)
    io_bytes = 2 * (4 * tile_b * data_dim + 4 * tile_b * 128 + 4 * 8 * tile_b)
    act_bytes = 4 * 4 * tile_b * h4p
    needed = weight_bytes + io_bytes + act_bytes
    try:
        vmem_cap = pltpu.get_tpu_info().vmem_capacity_bytes
    except Exception:
        vmem_cap = 64 * 1024 * 1024
    vmem_limit = int(min(0.85 * vmem_cap, max(needed + (8 << 20), 32 << 20)))

    flops = 2 * Bp * (data_dim * h4p + ncp * h4p + h4p * h4p + h4p * h2p + 8 * h2p)
    bytes_accessed = int(4 * Bp * (data_dim + 1) + weight_bytes + 4 * Bp)
    cost = pl.CostEstimate(flops=flops, transcendentals=0,
                           bytes_accessed=bytes_accessed)

    kernel = functools.partial(disc1_mlp_kernel, relu_bf16=relu_bf16)

    out_row = pl.pallas_call(
        kernel,
        out_shape=jax.ShapeDtypeStruct((1, Bp), jnp.float32),
        grid_spec=pltpu.PrefetchScalarGridSpec(
            num_scalar_prefetch=0,
            grid=(grid_b,),
            in_specs=[
                pl.BlockSpec((tile_b, data_dim), lambda i: (i, 0)),
                pl.BlockSpec((tile_b, 1), lambda i: (i, 0)),
                _invariant_weight_spec((data_dim, h4p)),
                _invariant_weight_spec((ncp, h4p)),
                _invariant_weight_spec((h4p, h4p)),
                _invariant_weight_spec((h4p, h2p)),
                _invariant_weight_spec((8, h2p)),
            ],
            out_specs=pl.BlockSpec((1, tile_b), lambda i: (0, i)),
        ),
        compiler_params=pltpu.CompilerParams(
            dimension_semantics=("parallel",),
            vmem_limit_bytes=vmem_limit),
        cost_estimate=cost,
    )(img_flat, lab, w1_img, w1e_eff, w2p, w3p, w4p)

    return out_row[0, :B].reshape(B, 1)


def init_params(key, *, n_classes, data_dim, hidden_dim):
    """Synthetic parameters matching Discriminator1.__init__ (all bias-free)."""
    emb_dim = n_classes * 5
    in_dim = emb_dim + data_dim
    k = jax.random.split(key, 5)
    scale = 0.05
    emb_table = scale * jax.random.normal(k[0], (n_classes, emb_dim), jnp.float32)
    # nn.Linear(in, out, bias=False) does x @ W.T with W (out, in); we store
    # (in, out) directly so y = x @ W gives identical semantics.
    w1 = scale * jax.random.normal(k[1], (in_dim, hidden_dim * 4), jnp.float32)
    w2 = scale * jax.random.normal(k[2], (hidden_dim * 4, hidden_dim * 4), jnp.float32)
    w3 = scale * jax.random.normal(k[3], (hidden_dim * 4, hidden_dim * 2), jnp.float32)
    w4 = scale * jax.random.normal(k[4], (hidden_dim * 2, 1), jnp.float32)
    return (emb_table, w1, w2, w3, w4)


def _leaky(x):
    return jnp.where(x > 0, x, 0.2 * x)


def _reference_f32(img, labels, params):
    """Pure-f32 reference (PyTorch semantics: cat(img_flat, emb(labels)) @ MLP)."""
    emb_table, w1, w2, w3, w4 = params
    B = img.shape[0]
    d_in = jnp.concatenate(
        [img.reshape(B, -1), jnp.take(emb_table, labels, axis=0)], axis=-1)
    h = _leaky(d_in @ w1)
    h = _leaky(h @ w2)
    h = _leaky(h @ w3)
    return h @ w4


def _reference_bf16(img, labels, params, relu_bf16):
    """Reference matching kernel numerics (bf16 operands, f32 accumulation,
    embedding folded into layer 1)."""
    emb_table, w1, w2, w3, w4 = params
    bf = jnp.bfloat16
    B = img.shape[0]
    emb_dim = emb_table.shape[1]
    data_dim = w1.shape[0] - emb_dim
    x = img.reshape(B, -1).astype(bf)
    w1_img = w1[:data_dim].astype(bf)
    w1e_eff = jnp.dot(emb_table, w1[data_dim:],
                      preferred_element_type=jnp.float32).astype(bf)
    h = jnp.dot(x, w1_img, preferred_element_type=jnp.float32)
    h = h + jnp.take(w1e_eff, labels, axis=0).astype(jnp.float32)
    h = _leaky_relu_to_bf16(h, relu_bf16)
    h = jnp.dot(h, w2.astype(bf), preferred_element_type=jnp.float32)
    h = _leaky_relu_to_bf16(h, relu_bf16)
    h = jnp.dot(h, w3.astype(bf), preferred_element_type=jnp.float32)
    h = _leaky_relu_to_bf16(h, relu_bf16)
    return jnp.dot(h, w4.astype(bf), preferred_element_type=jnp.float32)


if __name__ == "__main__":
    # Small synthetic config consistent with the module:
    #   opt.n_classes = 4, opt.dim = C*H*W = 2*4*4 = 32, opt.hidden_dim = 32
    n_classes = 4
    channels, img_size = 2, 4
    data_dim = channels * img_size * img_size
    hidden_dim = 32
    batch = 200                     # -> tile_b = 128, grid_b = 2 (pipelined)

    key = jax.random.PRNGKey(0)
    k_img, k_lab, k_par = jax.random.split(key, 3)
    img = jax.random.normal(k_img, (batch, channels, img_size, img_size),
                            jnp.float32)
    labels = jax.random.randint(k_lab, (batch,), 0, n_classes, jnp.int32)
    params = init_params(k_par, n_classes=n_classes, data_dim=data_dim,
                         hidden_dim=hidden_dim)
    prepared = prepare_params(params)
    relu_bf16 = _default_relu_bf16()

    validity = discriminator1_forward(img, labels, prepared, relu_bf16=relu_bf16)
    validity = jax.block_until_ready(validity)
    assert validity.shape == (batch, 1)

    # Tight check against a reference using the same bf16-operand numerics.
    ref_bf16 = _reference_bf16(img, labels, params, relu_bf16)
    err = float(jnp.max(jnp.abs(validity - ref_bf16)))
    assert err < 2e-3, err

    # Loose sanity check against the full-f32 reference.
    ref_f32 = _reference_f32(img, labels, params)
    assert float(jnp.max(jnp.abs(validity - ref_f32))) < 5e-2

    print("KERNEL_OK")
</pallas_src>

<mosaic_0001>
module attributes {stable_mosaic.version = 11 : i64} {
  func.func @disc1_mlp_kernel(%arg0: i32, %arg1: memref<128x32xf32, #tpu.memory_space<vmem>>, %arg2: memref<128x1xi32, #tpu.memory_space<vmem>>, %arg3: memref<32x128xbf16, #tpu.memory_space<vmem>>, %arg4: memref<128x128xbf16, #tpu.memory_space<vmem>>, %arg5: memref<128x128xbf16, #tpu.memory_space<vmem>>, %arg6: memref<128x128xbf16, #tpu.memory_space<vmem>>, %arg7: memref<8x128xbf16, #tpu.memory_space<vmem>>, %arg8: memref<1x128xf32, #tpu.memory_space<vmem>>) attributes {dimension_semantics = [#tpu.dimension_semantics<parallel>], iteration_bounds = array<i64: 2>, scalar_prefetch = 0 : i64, scratch_operands = 0 : i64, tpu.core_type = #tpu.core_type<tc>, window_params = [{transform_indices = @transform_0, window_bounds = array<i64: 128, 32>}, {transform_indices = @transform_1, window_bounds = array<i64: 128, 1>}, {pipeline_mode = #tpu.pipeline_mode<synchronous>, transform_indices = @transform_2, window_bounds = array<i64: 32, 128>}, {pipeline_mode = #tpu.pipeline_mode<synchronous>, transform_indices = @transform_3, window_bounds = array<i64: 128, 128>}, {pipeline_mode = #tpu.pipeline_mode<synchronous>, transform_indices = @transform_4, window_bounds = array<i64: 128, 128>}, {pipeline_mode = #tpu.pipeline_mode<synchronous>, transform_indices = @transform_5, window_bounds = array<i64: 128, 128>}, {pipeline_mode = #tpu.pipeline_mode<synchronous>, transform_indices = @transform_6, window_bounds = array<i64: 8, 128>}, {transform_indices = @transform_7, window_bounds = array<i64: 1, 128>}]} {
    %c0 = arith.constant 0 : index
    %c0_0 = arith.constant 0 : index
    %0 = vector.load %arg1[%c0, %c0_0] : memref<128x32xf32, #tpu.memory_space<vmem>>, vector<128x32xf32>
    %1 = arith.truncf %0 : vector<128x32xf32> to vector<128x32xbf16>
    %c0_1 = arith.constant 0 : index
    %c0_2 = arith.constant 0 : index
    %2 = vector.load %arg3[%c0_1, %c0_2] : memref<32x128xbf16, #tpu.memory_space<vmem>>, vector<32x128xbf16>
    %cst = arith.constant dense<0.000000e+00> : vector<128x128xf32>
    %3 = tpu.matmul %1, %2, %cst {dimension_numbers = #tpu.dot_dimension_numbers<[1], [0], [0], [1], [0, 0, 1, 1], [], []>} : vector<128x32xbf16>, vector<32x128xbf16>, vector<128x128xf32> -> vector<128x128xf32>
    %4 = tpu.iota {dimensions = array<i32: 1>} : vector<128x128xi32>
    %c0_3 = arith.constant 0 : index
    %c0_4 = arith.constant 0 : index
    %5 = vector.load %arg2[%c0_3, %c0_4] : memref<128x1xi32, #tpu.memory_space<vmem>>, vector<128x1xi32>
    %6 = vector.broadcast %5 : vector<128x1xi32> to vector<128x128xi32>
    %7 = arith.cmpi eq, %6, %4 : vector<128x128xi32>
    %8 = arith.extui %7 : vector<128x128xi1> to vector<128x128xi32>
    %9 = arith.sitofp %8 : vector<128x128xi32> to vector<128x128xf32>
    %10 = arith.truncf %9 : vector<128x128xf32> to vector<128x128xbf16>
    %c0_5 = arith.constant 0 : index
    %c0_6 = arith.constant 0 : index
    %11 = vector.load %arg4[%c0_5, %c0_6] : memref<128x128xbf16, #tpu.memory_space<vmem>>, vector<128x128xbf16>
    %cst_7 = arith.constant dense<0.000000e+00> : vector<128x128xf32>
    %12 = tpu.matmul %10, %11, %cst_7 {dimension_numbers = #tpu.dot_dimension_numbers<[1], [0], [0], [1], [0, 0, 1, 1], [], []>} : vector<128x128xbf16>, vector<128x128xbf16>, vector<128x128xf32> -> vector<128x128xf32>
    %13 = arith.addf %3, %12 : vector<128x128xf32>
    %14 = arith.truncf %13 : vector<128x128xf32> to vector<128x128xbf16>
    %cst_8 = arith.constant 0.000000e+00 : bf16
    %15 = vector.broadcast %cst_8 : bf16 to vector<128x128xbf16>
    %16 = arith.cmpf ogt, %14, %15 : vector<128x128xbf16>
    %cst_9 = arith.constant 2.001950e-01 : bf16
    %17 = vector.broadcast %cst_9 : bf16 to vector<128x128xbf16>
    %18 = arith.mulf %14, %17 : vector<128x128xbf16>
    %19 = arith.select %16, %14, %18 : vector<128x128xi1>, vector<128x128xbf16>
    %c0_10 = arith.constant 0 : index
    %c0_11 = arith.constant 0 : index
    %20 = vector.load %arg5[%c0_10, %c0_11] : memref<128x128xbf16, #tpu.memory_space<vmem>>, vector<128x128xbf16>
    %cst_12 = arith.constant dense<0.000000e+00> : vector<128x128xf32>
    %21 = tpu.matmul %19, %20, %cst_12 {dimension_numbers = #tpu.dot_dimension_numbers<[1], [0], [0], [1], [0, 0, 1, 1], [], []>} : vector<128x128xbf16>, vector<128x128xbf16>, vector<128x128xf32> -> vector<128x128xf32>
    %22 = arith.truncf %21 : vector<128x128xf32> to vector<128x128xbf16>
    %cst_13 = arith.constant 0.000000e+00 : bf16
    %23 = vector.broadcast %cst_13 : bf16 to vector<128x128xbf16>
    %24 = arith.cmpf ogt, %22, %23 : vector<128x128xbf16>
    %cst_14 = arith.constant 2.001950e-01 : bf16
    %25 = vector.broadcast %cst_14 : bf16 to vector<128x128xbf16>
    %26 = arith.mulf %22, %25 : vector<128x128xbf16>
    %27 = arith.select %24, %22, %26 : vector<128x128xi1>, vector<128x128xbf16>
    %c0_15 = arith.constant 0 : index
    %c0_16 = arith.constant 0 : index
    %28 = vector.load %arg6[%c0_15, %c0_16] : memref<128x128xbf16, #tpu.memory_space<vmem>>, vector<128x128xbf16>
    %cst_17 = arith.constant dense<0.000000e+00> : vector<128x128xf32>
    %29 = tpu.matmul %27, %28, %cst_17 {dimension_numbers = #tpu.dot_dimension_numbers<[1], [0], [0], [1], [0, 0, 1, 1], [], []>} : vector<128x128xbf16>, vector<128x128xbf16>, vector<128x128xf32> -> vector<128x128xf32>
    %30 = arith.truncf %29 : vector<128x128xf32> to vector<128x128xbf16>
    %cst_18 = arith.constant 0.000000e+00 : bf16
    %31 = vector.broadcast %cst_18 : bf16 to vector<128x128xbf16>
    %32 = arith.cmpf ogt, %30, %31 : vector<128x128xbf16>
    %cst_19 = arith.constant 2.001950e-01 : bf16
    %33 = vector.broadcast %cst_19 : bf16 to vector<128x128xbf16>
    %34 = arith.mulf %30, %33 : vector<128x128xbf16>
    %35 = arith.select %32, %30, %34 : vector<128x128xi1>, vector<128x128xbf16>
    %c0_20 = arith.constant 0 : index
    %c0_21 = arith.constant 0 : index
    %36 = vector.load %arg7[%c0_20, %c0_21] : memref<8x128xbf16, #tpu.memory_space<vmem>>, vector<8x128xbf16>
    %cst_22 = arith.constant dense<0.000000e+00> : vector<8x128xf32>
    %37 = tpu.matmul %36, %35, %cst_22 {dimension_numbers = #tpu.dot_dimension_numbers<[1], [1], [0], [0], [0, 0, 1, 0], [], []>} : vector<8x128xbf16>, vector<128x128xbf16>, vector<8x128xf32> -> vector<8x128xf32>
    %38 = vector.extract_strided_slice %37 {offsets = [0, 0], sizes = [1, 128], strides = [1, 1]} : vector<8x128xf32> to vector<1x128xf32>
    %c0_23 = arith.constant 0 : index
    %c0_24 = arith.constant 0 : index
    %39 = vector.load %arg8[%c0_23, %c0_24] : memref<1x128xf32, #tpu.memory_space<vmem>>, vector<1x128xf32>
    tpu.vector_store %arg8[%c0_23, %c0_24], %38 {strides = array<i32>} : memref<1x128xf32, #tpu.memory_space<vmem>>, vector<1x128xf32>,
    return
  }
  func.func @transform_0(%arg0: i32) -> (i32, i32) {
    %c0_i32 = arith.constant 0 : i32
    %c0_i32_0 = arith.constant 0 : i32
    return %arg0, %c0_i32 : i32, i32
  }
  func.func @transform_1(%arg0: i32) -> (i32, i32) {
    %c0_i32 = arith.constant 0 : i32
    %c0_i32_0 = arith.constant 0 : i32
    return %arg0, %c0_i32 : i32, i32
  }
  func.func @transform_2(%arg0: i32) -> (i32, i32) {
    %c0_i32 = arith.constant 0 : i32
    %c0_i32_0 = arith.constant 0 : i32
    %c0_i32_1 = arith.constant 0 : i32
    return %c0_i32, %c0_i32_0 : i32, i32
  }
  func.func @transform_3(%arg0: i32) -> (i32, i32) {
    %c0_i32 = arith.constant 0 : i32
    %c0_i32_0 = arith.constant 0 : i32
    %c0_i32_1 = arith.constant 0 : i32
    return %c0_i32, %c0_i32_0 : i32, i32
  }
  func.func @transform_4(%arg0: i32) -> (i32, i32) {
    %c0_i32 = arith.constant 0 : i32
    %c0_i32_0 = arith.constant 0 : i32
    %c0_i32_1 = arith.constant 0 : i32
    return %c0_i32, %c0_i32_0 : i32, i32
  }
  func.func @transform_5(%arg0: i32) -> (i32, i32) {
    %c0_i32 = arith.constant 0 : i32
    %c0_i32_0 = arith.constant 0 : i32
    %c0_i32_1 = arith.constant 0 : i32
    return %c0_i32, %c0_i32_0 : i32, i32
  }
  func.func @transform_6(%arg0: i32) -> (i32, i32) {
    %c0_i32 = arith.constant 0 : i32
    %c0_i32_0 = arith.constant 0 : i32
    %c0_i32_1 = arith.constant 0 : i32
    return %c0_i32, %c0_i32_0 : i32, i32
  }
  func.func @transform_7(%arg0: i32) -> (i32, i32) {
    %c0_i32 = arith.constant 0 : i32
    %c0_i32_0 = arith.constant 0 : i32
    return %c0_i32, %arg0 : i32, i32
  }
}

</mosaic_0001>

<bundles_post_ra>
// kernel: tpu_custom_call.1
= control target key start
LH: loop header
LB: loop body
LE: loop exit
PB: predicated region body
PF: predicated region fallthrough
CT: control target
= control target key end

     0   :  { %12 = vsyncpa [#allocation3], 0  ;;  %s2038_s0 = inlined_call_operand.vmem [shape: f32[256,32], index: 0, kind: input, shape index: {}]   ;;  %s2039_s1 = inlined_call_operand.vmem [shape: s32[256,1], index: 1, kind: input, shape index: {}]   ;;  %s2040_s2 = inlined_call_operand.vmem [shape: bf16[32,128], index: 2, kind: input, shape index: {}]   ;;  %s2041_s3 = inlined_call_operand.vmem [shape: bf16[128,128], index: 3, kind: input, shape index: {}]   ;;  %s2042_s4 = inlined_call_operand.vmem [shape: bf16[128,128], index: 4, kind: input, shape index: {}]   ;;  %s2043_s5 = inlined_call_operand.vmem [shape: bf16[128,128], index: 5, kind: input, shape index: {}]   ;;  %s2044_s6 = inlined_call_operand.vmem [shape: bf16[8,128], index: 6, kind: input, shape index: {}]   ;;  %s2045_s7 = inlined_call_operand.hbm [shape: f32[1,256], index: 7, kind: output, shape index: {}]  }
   0x1   :  { %14 = vsyncpa [#allocation3 + $0x1], 0  ;;  %s1781_s24 = smov 0   ;;  %s1783_s25 = smov 0  }
   0x2   :  { %s1785_s26 = smov 0   ;;  %s1787_s27 = smov 0  }
   0x3 LB: > { %s1802_s28 = sadd.s32 4294967295, %s1737_s27   ;;  %s1451_s29 = sadd.s32 4294967294, %s1737_s27   ;;  %s1737_s27 = sphi %s1787_s27, %s2051_s27   ;;  %s1733_s26 = sphi %s1785_s26, %s2050_s26   ;;  %s1729_s25 = sphi %s1783_s25, %s2049_s25   ;;  %s1725_s24 = sphi %s1781_s24, %s2048_s24  }
   0x4   : > { %s1806_s30 = sadd.s32 1, %s1737_s27   ;;  %s184_s8 = sadd.s32 1, %s1733_s26 }
   0x5   : > { %s181_s9 = ssub.s32 %s1737_s27, %s1806_s30  ;;  %p194_p0 = scmp.ne.s32.totalorder %s1733_s26, %s1729_s25 }
   0x6   : > { %p182_p1 = scmp.eq.s32.totalorder %s181_s9, 0  ;;  %p195_p2 = scmp.eq.s32.totalorder %s1802_s28, 1 }
   0x7   : > { %p200_p3 = scmp.ne.s32.totalorder %s1729_s25, %s1725_s24  ;;  %p201_p4 = scmp.eq.s32.totalorder %s1451_s29, 1 }
   0x8   : > { %s1817_s10 = scalar_select %p182_p1, %s1733_s26, %s184_s8  }
   0x9   : > { %p1819_p5 = por %p195_p2, %p194_p0  ;;  %p1823_p6 = por %p201_p4, %p200_p3 }
   0xa   : > { %p1454_p7 = scmp.ge.s32.totalorder %s1737_s27, 1  ;;  %p252_p8 = scmp.lt.s32.totalorder %s1737_s27, 3 }
   0xc   : > { %p253_p9 = pnand %p1454_p7, %p252_p8 }
   0xd   : > { %s1455_s13 = sshll.u32 (!%p253_p9), %s1802_s28, 4  ;;  %s286_s22 = sand.u32 (!%p253_p9), 1, %s1729_s25  }
   0xe   : > { %256 = sbr.rel (%p253_p9) target bundleno = 912 (0x390), region = 48  ;;  %p289_p10 = scmp.lt.s32.totalorder (!%p253_p9), %s1455_s13, 31 }
   0xf   : > { %s287_s9 = scalar_lea.vmem (!%p253_p9), [#allocation2], %s286_s22  ;;  %s1695_s20 = scalar_lea.hbm (!%p253_p9), %s2045_s7, 2 }
  0x10   : > { %s1382_s15 = sshll.u32 (!%p253_p9), %s287_s9, 4  ;;  %s1383_s15 = int_to_ptr.vmem [resolvable:$true] %s1382_s15 }
  0x13   : > { %v1739_v0 = vmov 0   ;;  %s2053_s13 = smov (!%p289_p10, %s1455_s13), 31  ;;  %v1614_v7 = vld [vmem:[%s2041_s3 + $0x38] sm:$0xff]  ;;  %v1613_v8 = vld [vmem:[%s2041_s3 + $0x30] sm:$0xff]  ;;  %v1606_v9 = vld [vmem:[%s2040_s2 + $0x8] sm:$0xff]  ;;  %vm576_vm0 = vcmask 261120   ;;  %v329_v36 = vlaneseq }
  0x14   : > { %1673 = vset.pattern.permute.xlu1 %v1739_v0  ;;  %1672 = vset.pattern.permute.xlu0 %v1739_v0  ;;  %s1456_s14 = sshll.u32 %s2053_s13, 3  ;;  %v1605_v12 = vld [vmem:[%s2040_s2] sm:$0xff]  ;;  %v1612_v13 = vld [vmem:[%s2041_s3 + $0x28] sm:$0xff]  ;;  %v1610_v18 = vld [vmem:[%s2041_s3 + $0x18] sm:$0xff]  ;;  %v1740_v40 = vmov 1.0|1.0  }
  0x15   : > { %1674 = vset.pattern.permute.xlu2 %v1739_v0  ;;  %s1838_s17 = scalar_lea.vmem %s2039_s1, %s1456_s14  ;;  %515 = vmatpush.bf16.msra.mxu0 %v1614_v7  ;;  %v1611_v15 = vld [vmem:[%s2041_s3 + $0x20] sm:$0xff]  ;;  %v1609_v20 = vld [vmem:[%s2041_s3 + $0x10] sm:$0xff]  ;;  %s1885_s8 = scalar_lea.vmem %s2038_s0, %s1456_s14  ;;  %v1608_v28 = vld [vmem:[%s2041_s3 + $0x8] sm:$0xff]  ;;  %v1902_v38 = vand.u32 127, %v329_v36 }
  0x16   : > { %v333_v1 = vld [vmem:[%s1838_s17 + $0x10] sm:$0xff]  ;;  %v331_v2 = vld [vmem:[%s1838_s17] sm:$0xff]  ;;  %v334_v4 = vld [vmem:[%s1838_s17 + $0x18] sm:$0xff]  ;;  %607 = vmatpush.bf16.msra.mxu1 %v1606_v9  ;;  %s1372_s14 = scalar_lea.sflag [#allocation3], %s286_s22 }
  0x17   : > { %354 = vperm.xlu1 %1673, %v333_v1   ;;  %348 = vperm.xlu0 %1672, %v331_v2   ;;  %v335_v3 = vld [vmem:[%s1838_s17 + $0x20] sm:$0xff]  ;;  %v332_v5 = vld [vmem:[%s1838_s17 + $0x8] sm:$0xff]  ;;  %v338_v10 = vld [vmem:[%s1838_s17 + $0x38] sm:$0xff] }
  0x18   : > { %360 = vperm.xlu2 %1674, %v335_v3   ;;  %v336_v6 = vld [vmem:[%s1838_s17 + $0x28] sm:$0xff]  ;;  %v337_v11 = vld [vmem:[%s1838_s17 + $0x30] sm:$0xff]  ;;  %v339_v14 = vld [vmem:[%s1838_s17 + $0x40] sm:$0xff] }
  0x19   : > { %516 = vmatpush.bf16.msra.mxu0 %v1613_v8  ;;  %v341_v16 = vld [vmem:[%s1838_s17 + $0x50] sm:$0xff]  ;;  %v340_v17 = vld [vmem:[%s1838_s17 + $0x48] sm:$0xff]  ;;  %v342_v19 = vld [vmem:[%s1838_s17 + $0x58] sm:$0xff] }
  0x1a   : > { %608 = vmatpush.bf16.msra.mxu1 %v1605_v12  ;;  %v344_v21 = vld [vmem:[%s1838_s17 + $0x68] sm:$0xff]  ;;  %v343_v22 = vld [vmem:[%s1838_s17 + $0x60] sm:$0xff]  ;;  %v345_v23 = vld [vmem:[%s1838_s17 + $0x70] sm:$0xff] }
  0x1b   : > { %v346_v24 = vld [vmem:[%s1838_s17 + $0x78] sm:$0xff]  ;;  %v301_v25 = vld [vmem:[%s1885_s8] sm:$0xff]  ;;  %v302_v26 = vld [vmem:[%s1885_s8 + $0x8] sm:$0xff] }
  0x1c   : > { %v317_v27 = vpack.c.bf16 %v302_v26, %v301_v25  ;;  %v1607_v29 = vld [vmem:[%s2041_s3] sm:$0xff]  ;;  %v303_v30 = vld [vmem:[%s1885_s8 + $0x10] sm:$0xff]  ;;  %v304_v31 = vld [vmem:[%s1885_s8 + $0x18] sm:$0xff] }
  0x1d   : > { %517 = vmatpush.bf16.msra.mxu0 %v1612_v13  ;;  %v318_v32 = vpack.c.bf16 %v304_v31, %v303_v30  ;;  %v305_v34 = vld [vmem:[%s1885_s8 + $0x20] sm:$0xff]  ;;  %v306_v35 = vld [vmem:[%s1885_s8 + $0x28] sm:$0xff]  ;;  %v307_v42 = vld [vmem:[%s1885_s8 + $0x30] sm:$0xff] }
  0x1e   : > { %1531 = vmatmul.msk.bf16.vlgmr.msra.gmra.mxu1 %vm576_vm0, %v317_v27  ;;  %v319_v37 = vpack.c.bf16 %v306_v35, %v305_v34  ;;  %v308_v43 = vld [vmem:[%s1885_s8 + $0x38] sm:$0xff]  ;;  %v309_v47 = vld [vmem:[%s1885_s8 + $0x40] sm:$0xff]  ;;  %v310_v48 = vld [vmem:[%s1885_s8 + $0x48] sm:$0xff] }
  0x1f   : > { %357 = vperm.xlu1 %1673, %v334_v4   ;;  %351 = vperm.xlu0 %1672, %v332_v5   ;;  %v320_v44 = vpack.c.bf16 %v308_v43, %v307_v42  ;;  %v321_v49 = vpack.c.bf16 %v310_v48, %v309_v47  ;;  %v311_v51 = vld [vmem:[%s1885_s8 + $0x50] sm:$0xff]  ;;  %v312_v52 = vld [vmem:[%s1885_s8 + $0x58] sm:$0xff]  ;;  %v313_v56 = vld [vmem:[%s1885_s8 + $0x60] sm:$0xff] }
  0x20   : > { %363 = vperm.xlu2 %1674, %v336_v6   ;;  %v322_v53 = vpack.c.bf16 %v312_v52, %v311_v51  ;;  %v314_v57 = vld [vmem:[%s1885_s8 + $0x68] sm:$0xff]  ;;  %v315_v61 = vld [vmem:[%s1885_s8 + $0x70] sm:$0xff]  ;;  %v316_v62 = vld [vmem:[%s1885_s8 + $0x78] sm:$0xff]  ;;  %s1380_s8 = scalar_lea.hbm %s2045_s7, %s1802_s28 }
  0x21   : > { %518 = vmatpush.bf16.msra.mxu0 %v1611_v15  ;;  %v323_v58 = vpack.c.bf16 %v314_v57, %v313_v56  ;;  %v324_v63 = vpack.c.bf16 %v316_v62, %v315_v61  ;;  %v1622_v2 = vld [vmem:[%s2042_s4 + $0x38] sm:$0xff]  ;;  %v1621_v3 = vld [vmem:[%s2042_s4 + $0x30] sm:$0xff]  ;;  %v1620_v6 = vld [vmem:[%s2042_s4 + $0x28] sm:$0xff]  ;;  %s1384_s13 = sshll.u32 %s1380_s8, 4  ;;  %s1385_s13 = int_to_ptr.hbm [resolvable:$true] %s1384_s13 }
  0x22   : > { %874 = vmatpush.bf16.msra.mxu2 %v1622_v2  ;;  %v1619_v8 = vld [vmem:[%s2042_s4 + $0x20] sm:$0xff]  ;;  %v1618_v9 = vld [vmem:[%s2042_s4 + $0x18] sm:$0xff]  ;;  %s1689_s17 = sshra.s32 %s1385_s13, 4  ;;  %s1690_s17 = int_to_ptr.hbm [resolvable:$true] %s1689_s17 }
  0x23   : > { %v1615_v15 = vld [vmem:[%s2042_s4] sm:$0xff]  ;;  %s1691_s16 = scalar_lea.hbm %s1690_s17, 1  ;;  %p1696_p0 = scmp.lt.s32.totalorder %s1690_s17, %s2045_s7 }
  0x24   : > { %p1692_p11 = scmp.ne.s32.totalorder %s1690_s17, %s1691_s16  ;;  %p1697_p1 = scmp.lt.s32.totalorder %s1695_s20, %s1691_s16 }
  0x25   : > { %519 = vmatpush.bf16.msra.mxu0 %v1610_v18 }
  0x26   : > { %875 = vmatpush.bf16.msra.mxu2 %v1621_v3  ;;  %p1693_p12 = pnand %p1692_p11, %p1819_p5  ;;  %p1698_p2 = por %p1697_p1, %p1696_p0 }
  0x27   : > { %369 = vperm.xlu1 %1673, %v338_v10   ;;  %366 = vperm.xlu0 %1672, %v337_v11   ;;  %v1617_v10 = vld [vmem:[%s2042_s4 + $0x10] sm:$0xff] }
  0x28   : > { %372 = vperm.xlu2 %1674, %v339_v14   ;;  %v1616_v14 = vld [vmem:[%s2042_s4 + $0x8] sm:$0xff]  ;;  %p1694_p13 = pneg %p1693_p12 }
  0x29   : > { %520 = vmatpush.bf16.msra.mxu0 %v1609_v20 }
  0x2a   : > { %876 = vmatpush.bf16.msra.mxu2 %v1620_v6  ;;  %p1699_p3 = pnand %p1698_p2, %p1694_p13 }
  0x2d   : > { %521 = vmatpush.bf16.msra.mxu0 %v1608_v28 }
  0x2e   : > { %1532 = vmatmul.msk.bf16.gmra.mxu1 %vm576_vm0, %v318_v32  ;;  %877 = vmatpush.bf16.msra.mxu2 %v1619_v8 }
  0x2f   : > { %378 = vperm.xlu1 %1673, %v341_v16   ;;  %375 = vperm.xlu0 %1672, %v340_v17  }
  0x30   : > { %381 = vperm.xlu2 %1674, %v342_v19  }
  0x31   : > { %522 = vmatpush.bf16.msra.mxu0 %v1607_v29 }
  0x32   : > { %878 = vmatpush.bf16.msra.mxu2 %v1618_v9 }
  0x36   : > { %879 = vmatpush.bf16.msra.mxu2 %v1617_v10 }
  0x37   : > { %387 = vperm.xlu1 %1673, %v344_v21   ;;  %384 = vperm.xlu0 %1672, %v343_v22  }
  0x38   : > { %390 = vperm.xlu2 %1674, %v345_v23  }
  0x3a   : > { %880 = vmatpush.bf16.msra.mxu2 %v1616_v14 }
  0x3e   : > { %1533 = vmatmul.msk.bf16.gmra.mxu1 %vm576_vm0, %v319_v37  ;;  %881 = vmatpush.bf16.msra.mxu2 %v1615_v15 }
  0x3f   : > { %393 = vperm.xlu0 %1672, %v346_v24  }
  0x4e   : > { %1534 = vmatmul.msk.bf16.gmra.mxu1 %vm576_vm0, %v320_v44 }
  0x5e   : > { %1535 = vmatmul.msk.bf16.gmra.mxu1 %vm576_vm0, %v321_v49 }
  0x6e   : > { %1536 = vmatmul.msk.bf16.gmra.mxu1 %vm576_vm0, %v322_v53 }
  0x72   : > { %v361_v46 = vpop.permute.xlu2 %360 }
  0x73   : > { %vm399_vm7 = vcmp.eq.s32.totalorder %v361_v46, %v1902_v38 }
  0x7a   : > { %v364_v50 = vpop.permute.xlu2 %363 }
  0x7b   : > { %vm400_vm8 = vcmp.eq.s32.totalorder %v364_v50, %v1902_v38 }
  0x7c   : > { %vm1511_vm9 = vmpackc.low %vm400_vm8, %vm399_vm7 }
  0x7e   : > { %1537 = vmatmul.msk.bf16.gmra.mxu1 %vm576_vm0, %v323_v58 }
  0x82   : > { %v373_v60 = vpop.permute.xlu2 %372 }
  0x83   : > { %vm403_vm13 = vcmp.eq.s32.totalorder %v373_v60, %v1902_v38 }
  0x89   : > { %v349_v33 = vpop.permute.xlu0 %348  ;;  %v355_v41 = vpop.permute.xlu1 %354 }
  0x8a   : > { %vm395_vm2 = vcmp.eq.s32.totalorder %v349_v33, %v1902_v38  ;;  %vm397_vm4 = vcmp.eq.s32.totalorder %v355_v41, %v1902_v38  ;;  %v382_v0 = vpop.permute.xlu2 %381 }
  0x8e   : > { %1538 = vmatmul.msk.bf16.gmra.mxu1 %vm576_vm0, %v324_v63 }
  0x91   : > { %v352_v39 = vpop.permute.xlu0 %351  ;;  %v358_v45 = vpop.permute.xlu1 %357 }
  0x92   : > { %vm396_vm1 = vcmp.eq.s32.totalorder %v352_v39, %v1902_v38  ;;  %vm398_vm5 = vcmp.eq.s32.totalorder %v358_v45, %v1902_v38  ;;  %v391_v13 = vpop.permute.xlu2 %390 }
  0x93   : > { %vm1507_vm3 = vmpackc.low %vm396_vm1, %vm395_vm2  ;;  %vm406_vm1 = vcmp.eq.s32.totalorder %v382_v0, %v1902_v38  ;;  %vm409_vm7 = vcmp.eq.s32.totalorder %v391_v13, %v1902_v38 }
  0x94   : > { %1508 = vmatmul.msk.bf16.vlgmr.msra.gmra.mxu0 %vm1507_vm3, %v1740_v40  ;;  %vm1509_vm6 = vmpackc.low %vm398_vm5, %vm397_vm4 }
  0x99   : > { %v370_v54 = vpop.permute.xlu1 %369  ;;  %v367_v55 = vpop.permute.xlu0 %366 }
  0x9a   : > { %vm402_vm10 = vcmp.eq.s32.totalorder %v370_v54, %v1902_v38  ;;  %vm401_vm11 = vcmp.eq.s32.totalorder %v367_v55, %v1902_v38 }
  0x9b   : > { %vm1513_vm12 = vmpackc.low %vm402_vm10, %vm401_vm11  ;;  %v610_v7 = vpop.f32.mrf.mxu1 }
  0xa1   : > { %v376_v59 = vpop.permute.xlu0 %375  ;;  %v379_v1 = vpop.permute.xlu1 %378 }
  0xa2   : > { %vm404_vm14 = vcmp.eq.s32.totalorder %v376_v59, %v1902_v38  ;;  %vm405_vm2 = vcmp.eq.s32.totalorder %v379_v1, %v1902_v38 }
  0xa3   : > { %vm1515_vm15 = vmpackc.low %vm404_vm14, %vm403_vm13  ;;  %v612_v12 = vpop.f32.mrf.mxu1 }
  0xa4   : > { %1510 = vmatmul.msk.bf16.gmra.mxu0 %vm1509_vm6, %v1740_v40  ;;  %vm1517_vm3 = vmpackc.low %vm406_vm1, %vm405_vm2 }
  0xa9   : > { %v388_v4 = vpop.permute.xlu1 %387  ;;  %v385_v5 = vpop.permute.xlu0 %384 }
  0xaa   : > { %vm408_vm0 = vcmp.eq.s32.totalorder %v388_v4, %v1902_v38  ;;  %vm407_vm4 = vcmp.eq.s32.totalorder %v385_v5, %v1902_v38 }
  0xab   : > { %vm1519_vm5 = vmpackc.low %vm408_vm0, %vm407_vm4  ;;  %v615_v16 = vpop.f32.mrf.mxu1 }
  0xb1   : > { %v394_v11 = vpop.permute.xlu0 %393 }
  0xb2   : > { %vm410_vm6 = vcmp.eq.s32.totalorder %v394_v11, %v1902_v38 }
  0xb3   : > { %vm1521_vm8 = vmpackc.low %vm410_vm6, %vm409_vm7  ;;  %v617_v18 = vpop.f32.mrf.mxu1 }
  0xb4   : > { %1512 = vmatmul.msk.bf16.gmra.mxu0 %vm1511_vm9, %v1740_v40 }
  0xbb   : > { %v620_v25 = vpop.f32.mrf.mxu1 }
  0xc3   : > { %v622_v38 = vpop.f32.mrf.mxu1 }
  0xc4   : > { %1514 = vmatmul.msk.bf16.gmra.mxu0 %vm1513_vm12, %v1740_v40 }
  0xcb   : > { %v625_v47 = vpop.f32.mrf.mxu1 }
  0xd3   : > { %v627_v60 = vpop.f32.mrf.mxu1 }
  0xd4   : > { %1516 = vmatmul.msk.bf16.gmra.mxu0 %vm1515_vm15, %v1740_v40 }
  0xe4   : > { %1518 = vmatmul.msk.bf16.gmra.mxu0 %vm1517_vm3, %v1740_v40 }
  0xf4   : > { %1520 = vmatmul.msk.bf16.gmra.mxu0 %vm1519_vm5, %v1740_v40 }
 0x104   : > { %1522 = vmatmul.msk.bf16.gmra.mxu0 %vm1521_vm8, %v1740_v40 }
 0x111   : > { %v524_v17 = vpop.f32.mrf.mxu0 }
 0x112   : > { %v611_v19 = vadd.f32 %v610_v7, %v524_v17  ;;  %v630_v7 = vpop.f32.mrf.mxu1 }
 0x114   : > { %v650_v20 = vpack.c.bf16 %v611_v19, %v611_v19 }
 0x116   : > { %v666_v21 = vunpack.c.l.bf16 %v650_v20 }
 0x118   : > { %v698_v23 = vmul.f32 0.20019531, %v666_v21  ;;  %vm682_vm9 = vcmp.gt.f32.partialorder %v666_v21, 0.0 }
 0x119   : > { %v526_v22 = vpop.f32.mrf.mxu0  ;;  %vm730_vm11 = vmpackc.low %vm682_vm9, %vm682_vm9 }
 0x11a   : > { %v613_v24 = vadd.f32 %v612_v12, %v526_v22  ;;  %v714_v27 = vpack.c.bf16 %v698_v23, %v698_v23 }
 0x11c   : > { %v651_v26 = vpack.c.bf16 %v613_v24, %v613_v24  ;;  %v746_v33 = vsel %vm730_vm11, %v650_v20, %v714_v27 }
 0x11d   : > { %v794_v36 = vunpack.c.l.b16 %v746_v33 }
 0x11e   : > { %v667_v28 = vunpack.c.l.bf16 %v651_v26 }
 0x120   : > { %vm683_vm10 = vcmp.gt.f32.partialorder %v667_v28, 0.0  ;;  %v699_v29 = vmul.f32 0.20019531, %v667_v28 }
 0x121   : > { %v529_v30 = vpop.f32.mrf.mxu0  ;;  %vm731_vm12 = vmpackc.low %vm683_vm10, %vm683_vm10 }
 0x122   : > { %v715_v31 = vpack.c.bf16 %v699_v29, %v699_v29  ;;  %v616_v32 = vadd.f32 %v615_v16, %v529_v30 }
 0x124   : > { %v652_v34 = vpack.c.bf16 %v616_v32, %v616_v32  ;;  %v747_v35 = vsel %vm731_vm12, %v651_v26, %v715_v31 }
 0x125   : > { %v795_v37 = vunpack.c.l.b16 %v747_v35 }
 0x126   : > { %v668_v39 = vunpack.c.l.bf16 %v652_v34 }
 0x127   : > { %v810_v40 = vpack.c.b16 %v795_v37, %v794_v36 }
 0x128   : > { %v700_v42 = vmul.f32 0.20019531, %v668_v39  ;;  %vm684_vm13 = vcmp.gt.f32.partialorder %v668_v39, 0.0 }
 0x129   : > { %v531_v41 = vpop.f32.mrf.mxu0  ;;  %882 = vmatmul.bf16.vlgmr.msra.gmra.mxu2 %v810_v40  ;;  %vm732_vm15 = vmpackc.low %vm684_vm13, %vm684_vm13 }
 0x12a   : > { %v618_v43 = vadd.f32 %v617_v18, %v531_v41  ;;  %v716_v45 = vpack.c.bf16 %v700_v42, %v700_v42  ;;  %v632_v18 = vpop.f32.mrf.mxu1 }
 0x12c   : > { %v653_v44 = vpack.c.bf16 %v618_v43, %v618_v43  ;;  %v748_v52 = vsel %vm732_vm15, %v652_v34, %v716_v45 }
 0x12d   : > { %v796_v55 = vunpack.c.l.b16 %v748_v52 }
 0x12e   : > { %v669_v46 = vunpack.c.l.bf16 %v653_v44 }
 0x130   : > { %vm685_vm14 = vcmp.gt.f32.partialorder %v669_v46, 0.0  ;;  %v701_v48 = vmul.f32 0.20019531, %v669_v46 }
 0x131   : > { %v534_v49 = vpop.f32.mrf.mxu0  ;;  %vm733_vm1 = vmpackc.low %vm685_vm14, %vm685_vm14 }
 0x132   : > { %v717_v50 = vpack.c.bf16 %v701_v48, %v701_v48  ;;  %v621_v51 = vadd.f32 %v620_v25, %v534_v49  ;;  %v635_v31 = vpop.f32.mrf.mxu1 }
 0x134   : > { %v654_v53 = vpack.c.bf16 %v621_v51, %v621_v51  ;;  %v749_v54 = vsel %vm733_vm1, %v653_v44, %v717_v50 }
 0x135   : > { %v797_v56 = vunpack.c.l.b16 %v749_v54 }
 0x136   : > { %v670_v57 = vunpack.c.l.bf16 %v654_v53 }
 0x137   : > { %v811_v58 = vpack.c.b16 %v797_v56, %v796_v55 }
 0x138   : > { %v702_v61 = vmul.f32 0.20019531, %v670_v57  ;;  %vm686_vm2 = vcmp.gt.f32.partialorder %v670_v57, 0.0 }
 0x139   : > { %v536_v59 = vpop.f32.mrf.mxu0  ;;  %887 = vmatmul.bf16.gmra.mxu2 %v811_v58  ;;  %vm734_vm0 = vmpackc.low %vm686_vm2, %vm686_vm2 }
 0x13a   : > { %v623_v62 = vadd.f32 %v622_v38, %v536_v59  ;;  %v718_v0 = vpack.c.bf16 %v702_v61, %v702_v61  ;;  %v637_v41 = vpop.f32.mrf.mxu1 }
 0x13c   : > { %v655_v63 = vpack.c.bf16 %v623_v62, %v623_v62  ;;  %v750_v6 = vsel %vm734_vm0, %v654_v53, %v718_v0 }
 0x13d   : > { %v798_v10 = vunpack.c.l.b16 %v750_v6 }
 0x13e   : > { %v671_v1 = vunpack.c.l.bf16 %v655_v63 }
 0x140   : > { %vm687_vm3 = vcmp.gt.f32.partialorder %v671_v1, 0.0  ;;  %v703_v2 = vmul.f32 0.20019531, %v671_v1 }
 0x141   : > { %v539_v3 = vpop.f32.mrf.mxu0  ;;  %vm735_vm4 = vmpackc.low %vm687_vm3, %vm687_vm3 }
 0x142   : > { %v719_v4 = vpack.c.bf16 %v703_v2, %v703_v2  ;;  %v626_v5 = vadd.f32 %v625_v47, %v539_v3  ;;  %v640_v54 = vpop.f32.mrf.mxu1 }
 0x144   : > { %v656_v8 = vpack.c.bf16 %v626_v5, %v626_v5  ;;  %v751_v9 = vsel %vm735_vm4, %v655_v63, %v719_v4 }
 0x145   : > { %v799_v11 = vunpack.c.l.b16 %v751_v9 }
 0x146   : > { %v672_v12 = vunpack.c.l.bf16 %v656_v8 }
 0x147   : > { %v812_v13 = vpack.c.b16 %v799_v11, %v798_v10  ;;  %v1629_v10 = vld [vmem:[%s2043_s5 + $0x30] sm:$0xff] }
 0x148   : > { %v704_v15 = vmul.f32 0.20019531, %v672_v12  ;;  %vm688_vm5 = vcmp.gt.f32.partialorder %v672_v12, 0.0 }
 0x149   : > { %v541_v14 = vpop.f32.mrf.mxu0  ;;  %892 = vmatmul.bf16.gmra.mxu2 %v812_v13  ;;  %vm736_vm7 = vmpackc.low %vm688_vm5, %vm688_vm5 }
 0x14a   : > { %v628_v16 = vadd.f32 %v627_v60, %v541_v14  ;;  %v720_v19 = vpack.c.bf16 %v704_v15, %v704_v15  ;;  %v642_v1 = vpop.f32.mrf.mxu1  ;;  %v1628_v15 = vld [vmem:[%s2043_s5 + $0x28] sm:$0xff] }
 0x14c   : > { %v657_v17 = vpack.c.bf16 %v628_v16, %v628_v16  ;;  %v752_v25 = vsel %vm736_vm7, %v656_v8, %v720_v19 }
 0x14d   : > { %v800_v28 = vunpack.c.l.b16 %v752_v25 }
 0x14e   : > { %v673_v20 = vunpack.c.l.bf16 %v657_v17 }
 0x150   : > { %vm689_vm6 = vcmp.gt.f32.partialorder %v673_v20, 0.0  ;;  %v705_v21 = vmul.f32 0.20019531, %v673_v20 }
 0x151   : > { %v544_v22 = vpop.f32.mrf.mxu0  ;;  %vm737_vm8 = vmpackc.low %vm689_vm6, %vm689_vm6 }
 0x152   : > { %v721_v23 = vpack.c.bf16 %v705_v21, %v705_v21  ;;  %v631_v24 = vadd.f32 %v630_v7, %v544_v22  ;;  %v1630_v7 = vld [vmem:[%s2043_s5 + $0x38] sm:$0xff]  ;;  %v645_v14 = vpop.f32.mrf.mxu1 }
 0x153   : > { %1147 = vmatpush.bf16.msra.mxu3 %v1630_v7 }
 0x154   : > { %v658_v26 = vpack.c.bf16 %v631_v24, %v631_v24  ;;  %v753_v27 = vsel %vm737_vm8, %v657_v17, %v721_v23 }
 0x155   : > { %v801_v29 = vunpack.c.l.b16 %v753_v27 }
 0x156   : > { %v674_v30 = vunpack.c.l.bf16 %v658_v26 }
 0x157   : > { %v813_v32 = vpack.c.b16 %v801_v29, %v800_v28  ;;  %1148 = vmatpush.bf16.msra.mxu3 %v1629_v10 }
 0x158   : > { %v706_v34 = vmul.f32 0.20019531, %v674_v30  ;;  %vm690_vm9 = vcmp.gt.f32.partialorder %v674_v30, 0.0 }
 0x159   : > { %v546_v33 = vpop.f32.mrf.mxu0  ;;  %897 = vmatmul.bf16.gmra.mxu2 %v813_v32  ;;  %vm738_vm11 = vmpackc.low %vm690_vm9, %vm690_vm9  ;;  %v1627_v32 = vld [vmem:[%s2043_s5 + $0x20] sm:$0xff] }
 0x15a   : > { %v633_v35 = vadd.f32 %v632_v18, %v546_v33  ;;  %v722_v37 = vpack.c.bf16 %v706_v34, %v706_v34  ;;  %v647_v27 = vpop.f32.mrf.mxu1 }
 0x15b   : > { %1149 = vmatpush.bf16.msra.mxu3 %v1628_v15 }
 0x15c   : > { %v659_v36 = vpack.c.bf16 %v633_v35, %v633_v35  ;;  %v754_v44 = vsel %vm738_vm11, %v658_v26, %v722_v37 }
 0x15d   : > { %v802_v47 = vunpack.c.l.b16 %v754_v44  ;;  %v1624_v44 = vld [vmem:[%s2043_s5 + $0x8] sm:$0xff] }
 0x15e   : > { %v675_v38 = vunpack.c.l.bf16 %v659_v36 }
 0x15f   : > { %1150 = vmatpush.bf16.msra.mxu3 %v1627_v32 }
 0x160   : > { %vm691_vm10 = vcmp.gt.f32.partialorder %v675_v38, 0.0  ;;  %v707_v39 = vmul.f32 0.20019531, %v675_v38 }
 0x161   : > { %v549_v40 = vpop.f32.mrf.mxu0  ;;  %vm739_vm12 = vmpackc.low %vm691_vm10, %vm691_vm10 }
 0x162   : > { %v723_v42 = vpack.c.bf16 %v707_v39, %v707_v39  ;;  %v636_v43 = vadd.f32 %v635_v31, %v549_v40 }
 0x164   : > { %v660_v45 = vpack.c.bf16 %v636_v43, %v636_v43  ;;  %v755_v46 = vsel %vm739_vm12, %v659_v36, %v723_v42  ;;  %v1626_v36 = vld [vmem:[%s2043_s5 + $0x18] sm:$0xff]  ;;  %v1625_v42 = vld [vmem:[%s2043_s5 + $0x10] sm:$0xff] }
 0x165   : > { %v803_v48 = vunpack.c.l.b16 %v755_v46  ;;  %1151 = vmatpush.bf16.msra.mxu3 %v1626_v36 }
 0x166   : > { %v676_v49 = vunpack.c.l.bf16 %v660_v45 }
 0x167   : > { %v814_v50 = vpack.c.b16 %v803_v48, %v802_v47 }
 0x168   : > { %v708_v52 = vmul.f32 0.20019531, %v676_v49  ;;  %vm692_vm13 = vcmp.gt.f32.partialorder %v676_v49, 0.0 }
 0x169   : > { %v551_v51 = vpop.f32.mrf.mxu0  ;;  %902 = vmatmul.bf16.gmra.mxu2 %v814_v50  ;;  %vm740_vm15 = vmpackc.low %vm692_vm13, %vm692_vm13  ;;  %1152 = vmatpush.bf16.msra.mxu3 %v1625_v42 }
 0x16a   : > { %v638_v53 = vadd.f32 %v637_v41, %v551_v51  ;;  %v724_v56 = vpack.c.bf16 %v708_v52, %v708_v52 }
 0x16c   : > { %v661_v55 = vpack.c.bf16 %v638_v53, %v638_v53  ;;  %v756_v62 = vsel %vm740_vm15, %v660_v45, %v724_v56  ;;  %v1623_v45 = vld [vmem:[%s2043_s5] sm:$0xff] }
 0x16d   : > { %v804_v2 = vunpack.c.l.b16 %v756_v62  ;;  %1153 = vmatpush.bf16.msra.mxu3 %v1624_v44 }
 0x16e   : > { %v677_v57 = vunpack.c.l.bf16 %v661_v55 }
 0x170   : > { %vm693_vm14 = vcmp.gt.f32.partialorder %v677_v57, 0.0  ;;  %v709_v58 = vmul.f32 0.20019531, %v677_v57 }
 0x171   : > { %v554_v59 = vpop.f32.mrf.mxu0  ;;  %vm741_vm1 = vmpackc.low %vm693_vm14, %vm693_vm14  ;;  %1154 = vmatpush.bf16.msra.mxu3 %v1623_v45 }
 0x172   : > { %v725_v60 = vpack.c.bf16 %v709_v58, %v709_v58  ;;  %v641_v61 = vadd.f32 %v640_v54, %v554_v59 }
 0x174   : > { %v662_v63 = vpack.c.bf16 %v641_v61, %v641_v61  ;;  %v757_v0 = vsel %vm741_vm1, %v661_v55, %v725_v60 }
 0x175   : > { %v805_v3 = vunpack.c.l.b16 %v757_v0 }
 0x176   : > { %v678_v4 = vunpack.c.l.bf16 %v662_v63 }
 0x177   : > { %v815_v5 = vpack.c.b16 %v805_v3, %v804_v2 }
 0x178   : > { %v710_v8 = vmul.f32 0.20019531, %v678_v4  ;;  %vm694_vm2 = vcmp.gt.f32.partialorder %v678_v4, 0.0 }
 0x179   : > { %v556_v6 = vpop.f32.mrf.mxu0  ;;  %907 = vmatmul.bf16.gmra.mxu2 %v815_v5  ;;  %vm742_vm0 = vmpackc.low %vm694_vm2, %vm694_vm2 }
 0x17a   : > { %v643_v9 = vadd.f32 %v642_v1, %v556_v6  ;;  %v726_v12 = vpack.c.bf16 %v710_v8, %v710_v8 }
 0x17c   : > { %v663_v11 = vpack.c.bf16 %v643_v9, %v643_v9  ;;  %v758_v20 = vsel %vm742_vm0, %v662_v63, %v726_v12 }
 0x17d   : > { %v806_v23 = vunpack.c.l.b16 %v758_v20 }
 0x17e   : > { %v679_v13 = vunpack.c.l.bf16 %v663_v11 }
 0x180   : > { %vm695_vm3 = vcmp.gt.f32.partialorder %v679_v13, 0.0  ;;  %v711_v16 = vmul.f32 0.20019531, %v679_v13 }
 0x181   : > { %v559_v17 = vpop.f32.mrf.mxu0  ;;  %vm743_vm4 = vmpackc.low %vm695_vm3, %vm695_vm3 }
 0x182   : > { %v727_v18 = vpack.c.bf16 %v711_v16, %v711_v16  ;;  %v646_v19 = vadd.f32 %v645_v14, %v559_v17 }
 0x184   : > { %v664_v21 = vpack.c.bf16 %v646_v19, %v646_v19  ;;  %v759_v22 = vsel %vm743_vm4, %v663_v11, %v727_v18 }
 0x185   : > { %v807_v24 = vunpack.c.l.b16 %v759_v22 }
 0x186   : > { %v680_v25 = vunpack.c.l.bf16 %v664_v21 }
 0x187   : > { %v816_v26 = vpack.c.b16 %v807_v24, %v806_v23 }
 0x188   : > { %v712_v29 = vmul.f32 0.20019531, %v680_v25  ;;  %vm696_vm5 = vcmp.gt.f32.partialorder %v680_v25, 0.0 }
 0x189   : > { %v561_v28 = vpop.f32.mrf.mxu0  ;;  %912 = vmatmul.bf16.gmra.mxu2 %v816_v26  ;;  %vm744_vm7 = vmpackc.low %vm696_vm5, %vm696_vm5 }
 0x18a   : > { %v648_v30 = vadd.f32 %v647_v27, %v561_v28  ;;  %v728_v33 = vpack.c.bf16 %v712_v29, %v712_v29 }
 0x18c   : > { %v665_v31 = vpack.c.bf16 %v648_v30, %v648_v30  ;;  %v760_v38 = vsel %vm744_vm7, %v664_v21, %v728_v33 }
 0x18d   : > { %v808_v40 = vunpack.c.l.b16 %v760_v38 }
 0x18e   : > { %v681_v34 = vunpack.c.l.bf16 %v665_v31 }
 0x190   : > { %vm697_vm6 = vcmp.gt.f32.partialorder %v681_v34, 0.0  ;;  %v713_v35 = vmul.f32 0.20019531, %v681_v34 }
 0x191   : > { %vm745_vm8 = vmpackc.low %vm697_vm6, %vm697_vm6 }
 0x192   : > { %v729_v37 = vpack.c.bf16 %v713_v35, %v713_v35 }
 0x194   : > { %v761_v39 = vsel %vm745_vm8, %v665_v31, %v729_v37 }
 0x195   : > { %v809_v41 = vunpack.c.l.b16 %v761_v39 }
 0x197   : > { %v817_v43 = vpack.c.b16 %v809_v41, %v808_v40 }
 0x199   : > { %917 = vmatmul.bf16.gmra.mxu2 %v817_v43 }
 0x1ac   : > { %v883_v46 = vpop.f32.mrf.mxu2 }
 0x1ad   : > { %v923_v47 = vpack.c.bf16 %v883_v46, %v883_v46 }
 0x1af   : > { %v939_v48 = vunpack.c.l.bf16 %v923_v47 }
 0x1b1   : > { %v971_v49 = vmul.f32 0.20019531, %v939_v48  ;;  %vm955_vm9 = vcmp.gt.f32.partialorder %v939_v48, 0.0 }
 0x1b2   : > { %vm1003_vm11 = vmpackc.low %vm955_vm9, %vm955_vm9 }
 0x1b3   : > { %v987_v52 = vpack.c.bf16 %v971_v49, %v971_v49 }
 0x1b4   : > { %v885_v50 = vpop.f32.mrf.mxu2 }
 0x1b5   : > { %v924_v51 = vpack.c.bf16 %v885_v50, %v885_v50  ;;  %v1019_v56 = vsel %vm1003_vm11, %v923_v47, %v987_v52 }
 0x1b6   : > { %v1067_v60 = vunpack.c.l.b16 %v1019_v56 }
 0x1b7   : > { %v940_v53 = vunpack.c.l.bf16 %v924_v51 }
 0x1b9   : > { %vm956_vm10 = vcmp.gt.f32.partialorder %v940_v53, 0.0  ;;  %v972_v54 = vmul.f32 0.20019531, %v940_v53 }
 0x1ba   : > { %vm1004_vm12 = vmpackc.low %vm956_vm10, %vm956_vm10 }
 0x1bb   : > { %v988_v55 = vpack.c.bf16 %v972_v54, %v972_v54 }
 0x1bc   : > { %v888_v57 = vpop.f32.mrf.mxu2 }
 0x1bd   : > { %v925_v58 = vpack.c.bf16 %v888_v57, %v888_v57  ;;  %v1020_v59 = vsel %vm1004_vm12, %v924_v51, %v988_v55 }
 0x1be   : > { %v1068_v61 = vunpack.c.l.b16 %v1020_v59 }
 0x1bf   : > { %v941_v62 = vunpack.c.l.bf16 %v925_v58 }
 0x1c0   : > { %v1083_v63 = vpack.c.b16 %v1068_v61, %v1067_v60 }
 0x1c1   : > { %v973_v0 = vmul.f32 0.20019531, %v941_v62  ;;  %vm957_vm13 = vcmp.gt.f32.partialorder %v941_v62, 0.0 }
 0x1c2   : > { %1155 = vmatmul.bf16.vlgmr.msra.gmra.mxu3 %v1083_v63  ;;  %vm1005_vm15 = vmpackc.low %vm957_vm13, %vm957_vm13 }
 0x1c3   : > { %v989_v3 = vpack.c.bf16 %v973_v0, %v973_v0 }
 0x1c4   : > { %v890_v1 = vpop.f32.mrf.mxu2 }
 0x1c5   : > { %v926_v2 = vpack.c.bf16 %v890_v1, %v890_v1  ;;  %v1021_v7 = vsel %vm1005_vm15, %v925_v58, %v989_v3 }
 0x1c6   : > { %v1069_v11 = vunpack.c.l.b16 %v1021_v7 }
 0x1c7   : > { %v942_v4 = vunpack.c.l.bf16 %v926_v2 }
 0x1c9   : > { %vm958_vm14 = vcmp.gt.f32.partialorder %v942_v4, 0.0  ;;  %v974_v5 = vmul.f32 0.20019531, %v942_v4 }
 0x1ca   : > { %vm1006_vm1 = vmpackc.low %vm958_vm14, %vm958_vm14 }
 0x1cb   : > { %v990_v6 = vpack.c.bf16 %v974_v5, %v974_v5 }
 0x1cc   : > { %v893_v8 = vpop.f32.mrf.mxu2 }
 0x1cd   : > { %v927_v9 = vpack.c.bf16 %v893_v8, %v893_v8  ;;  %v1022_v10 = vsel %vm1006_vm1, %v926_v2, %v990_v6 }
 0x1ce   : > { %v1070_v12 = vunpack.c.l.b16 %v1022_v10 }
 0x1cf   : > { %v943_v13 = vunpack.c.l.bf16 %v927_v9 }
 0x1d0   : > { %v1084_v14 = vpack.c.b16 %v1070_v12, %v1069_v11 }
 0x1d1   : > { %v975_v15 = vmul.f32 0.20019531, %v943_v13  ;;  %vm959_vm2 = vcmp.gt.f32.partialorder %v943_v13, 0.0 }
 0x1d2   : > { %1160 = vmatmul.bf16.gmra.mxu3 %v1084_v14  ;;  %vm1007_vm0 = vmpackc.low %vm959_vm2, %vm959_vm2 }
 0x1d3   : > { %v991_v18 = vpack.c.bf16 %v975_v15, %v975_v15 }
 0x1d4   : > { %v895_v16 = vpop.f32.mrf.mxu2 }
 0x1d5   : > { %v928_v17 = vpack.c.bf16 %v895_v16, %v895_v16  ;;  %v1023_v22 = vsel %vm1007_vm0, %v927_v9, %v991_v18 }
 0x1d6   : > { %v1071_v26 = vunpack.c.l.b16 %v1023_v22 }
 0x1d7   : > { %v944_v19 = vunpack.c.l.bf16 %v928_v17 }
 0x1d9   : > { %vm960_vm3 = vcmp.gt.f32.partialorder %v944_v19, 0.0  ;;  %v976_v20 = vmul.f32 0.20019531, %v944_v19 }
 0x1da   : > { %vm1008_vm4 = vmpackc.low %vm960_vm3, %vm960_vm3 }
 0x1db   : > { %v992_v21 = vpack.c.bf16 %v976_v20, %v976_v20 }
 0x1dc   : > { %v898_v23 = vpop.f32.mrf.mxu2 }
 0x1dd   : > { %v929_v24 = vpack.c.bf16 %v898_v23, %v898_v23  ;;  %v1024_v25 = vsel %vm1008_vm4, %v928_v17, %v992_v21 }
 0x1de   : > { %v1072_v27 = vunpack.c.l.b16 %v1024_v25 }
 0x1df   : > { %v945_v28 = vunpack.c.l.bf16 %v929_v24 }
 0x1e0   : > { %v1085_v29 = vpack.c.b16 %v1072_v27, %v1071_v26 }
 0x1e1   : > { %v977_v30 = vmul.f32 0.20019531, %v945_v28  ;;  %vm961_vm5 = vcmp.gt.f32.partialorder %v945_v28, 0.0 }
 0x1e2   : > { %1165 = vmatmul.bf16.gmra.mxu3 %v1085_v29  ;;  %vm1009_vm7 = vmpackc.low %vm961_vm5, %vm961_vm5 }
 0x1e3   : > { %v993_v33 = vpack.c.bf16 %v977_v30, %v977_v30 }
 0x1e4   : > { %v900_v31 = vpop.f32.mrf.mxu2 }
 0x1e5   : > { %v930_v32 = vpack.c.bf16 %v900_v31, %v900_v31  ;;  %v1025_v37 = vsel %vm1009_vm7, %v929_v24, %v993_v33 }
 0x1e6   : > { %v1073_v41 = vunpack.c.l.b16 %v1025_v37 }
 0x1e7   : > { %v946_v34 = vunpack.c.l.bf16 %v930_v32 }
 0x1e9   : > { %vm962_vm6 = vcmp.gt.f32.partialorder %v946_v34, 0.0  ;;  %v978_v35 = vmul.f32 0.20019531, %v946_v34 }
 0x1ea   : > { %vm1010_vm8 = vmpackc.low %vm962_vm6, %vm962_vm6 }
 0x1eb   : > { %v994_v36 = vpack.c.bf16 %v978_v35, %v978_v35 }
 0x1ec   : > { %v903_v38 = vpop.f32.mrf.mxu2 }
 0x1ed   : > { %v931_v39 = vpack.c.bf16 %v903_v38, %v903_v38  ;;  %v1026_v40 = vsel %vm1010_vm8, %v930_v32, %v994_v36 }
 0x1ee   : > { %v1074_v42 = vunpack.c.l.b16 %v1026_v40 }
 0x1ef   : > { %v947_v43 = vunpack.c.l.bf16 %v931_v39 }
 0x1f0   : > { %v1086_v44 = vpack.c.b16 %v1074_v42, %v1073_v41 }
 0x1f1   : > { %v979_v45 = vmul.f32 0.20019531, %v947_v43  ;;  %vm963_vm9 = vcmp.gt.f32.partialorder %v947_v43, 0.0 }
 0x1f2   : > { %1170 = vmatmul.bf16.gmra.mxu3 %v1086_v44  ;;  %vm1011_vm11 = vmpackc.low %vm963_vm9, %vm963_vm9 }
 0x1f3   : > { %v995_v48 = vpack.c.bf16 %v979_v45, %v979_v45 }
 0x1f4   : > { %v905_v46 = vpop.f32.mrf.mxu2 }
 0x1f5   : > { %v932_v47 = vpack.c.bf16 %v905_v46, %v905_v46  ;;  %v1027_v52 = vsel %vm1011_vm11, %v931_v39, %v995_v48 }
 0x1f6   : > { %v1075_v56 = vunpack.c.l.b16 %v1027_v52 }
 0x1f7   : > { %v948_v49 = vunpack.c.l.bf16 %v932_v47 }
 0x1f9   : > { %vm964_vm10 = vcmp.gt.f32.partialorder %v948_v49, 0.0  ;;  %v980_v50 = vmul.f32 0.20019531, %v948_v49 }
 0x1fa   : > { %vm1012_vm12 = vmpackc.low %vm964_vm10, %vm964_vm10 }
 0x1fb   : > { %v996_v51 = vpack.c.bf16 %v980_v50, %v980_v50 }
 0x1fc   : > { %v908_v53 = vpop.f32.mrf.mxu2 }
 0x1fd   : > { %v933_v54 = vpack.c.bf16 %v908_v53, %v908_v53  ;;  %v1028_v55 = vsel %vm1012_vm12, %v932_v47, %v996_v51 }
 0x1fe   : > { %v1076_v57 = vunpack.c.l.b16 %v1028_v55 }
 0x1ff   : > { %v949_v58 = vunpack.c.l.bf16 %v933_v54 }
 0x200   : > { %v1087_v59 = vpack.c.b16 %v1076_v57, %v1075_v56 }
 0x201   : > { %v981_v60 = vmul.f32 0.20019531, %v949_v58  ;;  %vm965_vm13 = vcmp.gt.f32.partialorder %v949_v58, 0.0 }
 0x202   : > { %1175 = vmatmul.bf16.gmra.mxu3 %v1087_v59  ;;  %vm1013_vm15 = vmpackc.low %vm965_vm13, %vm965_vm13 }
 0x203   : > { %v997_v63 = vpack.c.bf16 %v981_v60, %v981_v60 }
 0x204   : > { %v910_v61 = vpop.f32.mrf.mxu2 }
 0x205   : > { %v934_v62 = vpack.c.bf16 %v910_v61, %v910_v61  ;;  %v1029_v3 = vsel %vm1013_vm15, %v933_v54, %v997_v63 }
 0x206   : > { %v1077_v7 = vunpack.c.l.b16 %v1029_v3 }
 0x207   : > { %v950_v0 = vunpack.c.l.bf16 %v934_v62 }
 0x209   : > { %vm966_vm14 = vcmp.gt.f32.partialorder %v950_v0, 0.0  ;;  %v982_v1 = vmul.f32 0.20019531, %v950_v0 }
 0x20a   : > { %vm1014_vm1 = vmpackc.low %vm966_vm14, %vm966_vm14 }
 0x20b   : > { %v998_v2 = vpack.c.bf16 %v982_v1, %v982_v1 }
 0x20c   : > { %v913_v4 = vpop.f32.mrf.mxu2 }
 0x20d   : > { %v935_v5 = vpack.c.bf16 %v913_v4, %v913_v4  ;;  %v1030_v6 = vsel %vm1014_vm1, %v934_v62, %v998_v2 }
 0x20e   : > { %v1078_v8 = vunpack.c.l.b16 %v1030_v6 }
 0x20f   : > { %v951_v9 = vunpack.c.l.bf16 %v935_v5 }
 0x210   : > { %v1088_v10 = vpack.c.b16 %v1078_v8, %v1077_v7 }
 0x211   : > { %v983_v11 = vmul.f32 0.20019531, %v951_v9  ;;  %vm967_vm2 = vcmp.gt.f32.partialorder %v951_v9, 0.0 }
 0x212   : > { %1180 = vmatmul.bf16.gmra.mxu3 %v1088_v10  ;;  %vm1015_vm0 = vmpackc.low %vm967_vm2, %vm967_vm2 }
 0x213   : > { %v999_v14 = vpack.c.bf16 %v983_v11, %v983_v11 }
 0x214   : > { %v915_v12 = vpop.f32.mrf.mxu2 }
 0x215   : > { %v936_v13 = vpack.c.bf16 %v915_v12, %v915_v12  ;;  %v1031_v18 = vsel %vm1015_vm0, %v935_v5, %v999_v14 }
 0x216   : > { %v1079_v22 = vunpack.c.l.b16 %v1031_v18 }
 0x217   : > { %v952_v15 = vunpack.c.l.bf16 %v936_v13 }
 0x219   : > { %vm968_vm3 = vcmp.gt.f32.partialorder %v952_v15, 0.0  ;;  %v984_v16 = vmul.f32 0.20019531, %v952_v15 }
 0x21a   : > { %vm1016_vm4 = vmpackc.low %vm968_vm3, %vm968_vm3 }
 0x21b   : > { %v1000_v17 = vpack.c.bf16 %v984_v16, %v984_v16 }
 0x21c   : > { %v918_v19 = vpop.f32.mrf.mxu2 }
 0x21d   : > { %v937_v20 = vpack.c.bf16 %v918_v19, %v918_v19  ;;  %v1032_v21 = vsel %vm1016_vm4, %v936_v13, %v1000_v17 }
 0x21e   : > { %v1080_v23 = vunpack.c.l.b16 %v1032_v21 }
 0x21f   : > { %v953_v24 = vunpack.c.l.bf16 %v937_v20 }
 0x220   : > { %v1089_v25 = vpack.c.b16 %v1080_v23, %v1079_v22 }
 0x221   : > { %v985_v26 = vmul.f32 0.20019531, %v953_v24  ;;  %vm969_vm5 = vcmp.gt.f32.partialorder %v953_v24, 0.0 }
 0x222   : > { %1185 = vmatmul.bf16.gmra.mxu3 %v1089_v25  ;;  %vm1017_vm7 = vmpackc.low %vm969_vm5, %vm969_vm5 }
 0x223   : > { %v1001_v29 = vpack.c.bf16 %v985_v26, %v985_v26 }
 0x224   : > { %v920_v27 = vpop.f32.mrf.mxu2 }
 0x225   : > { %v938_v28 = vpack.c.bf16 %v920_v27, %v920_v27  ;;  %v1033_v33 = vsel %vm1017_vm7, %v937_v20, %v1001_v29 }
 0x226   : > { %v1081_v35 = vunpack.c.l.b16 %v1033_v33 }
 0x227   : > { %v954_v30 = vunpack.c.l.bf16 %v938_v28 }
 0x229   : > { %vm970_vm6 = vcmp.gt.f32.partialorder %v954_v30, 0.0  ;;  %v986_v31 = vmul.f32 0.20019531, %v954_v30 }
 0x22a   : > { %vm1018_vm8 = vmpackc.low %vm970_vm6, %vm970_vm6 }
 0x22b   : > { %v1002_v32 = vpack.c.bf16 %v986_v31, %v986_v31 }
 0x22d   : > { %v1034_v34 = vsel %vm1018_vm8, %v938_v28, %v1002_v32 }
 0x22e   : > { %v1082_v36 = vunpack.c.l.b16 %v1034_v34 }
 0x230   : > { %v1090_v37 = vpack.c.b16 %v1082_v36, %v1081_v35 }
 0x232   : > { %1190 = vmatmul.bf16.gmra.mxu3 %v1090_v37 }
 0x245   : > { %v1156_v38 = vpop.f32.mrf.mxu3 }
 0x246   : > { %v1196_v39 = vpack.c.bf16 %v1156_v38, %v1156_v38 }
 0x248   : > { %v1212_v40 = vunpack.c.l.bf16 %v1196_v39 }
 0x24a   : > { %v1244_v41 = vmul.f32 0.20019531, %v1212_v40  ;;  %vm1228_vm9 = vcmp.gt.f32.partialorder %v1212_v40, 0.0 }
 0x24b   : > { %vm1276_vm11 = vmpackc.low %vm1228_vm9, %vm1228_vm9 }
 0x24c   : > { %v1260_v44 = vpack.c.bf16 %v1244_v41, %v1244_v41 }
 0x24d   : > { %v1158_v42 = vpop.f32.mrf.mxu3 }
 0x24e   : > { %v1197_v43 = vpack.c.bf16 %v1158_v42, %v1158_v42  ;;  %v1292_v48 = vsel %vm1276_vm11, %v1196_v39, %v1260_v44 }
 0x24f   : > { %v1325_v52 = vunpack.c.l.b16 %v1292_v48 }
 0x250   : > { %v1213_v45 = vunpack.c.l.bf16 %v1197_v43 }
 0x252   : > { %vm1229_vm10 = vcmp.gt.f32.partialorder %v1213_v45, 0.0  ;;  %v1245_v46 = vmul.f32 0.20019531, %v1213_v45 }
 0x253   : > { %vm1277_vm12 = vmpackc.low %vm1229_vm10, %vm1229_vm10 }
 0x254   : > { %v1261_v47 = vpack.c.bf16 %v1245_v46, %v1245_v46 }
 0x255   : > { %v1161_v49 = vpop.f32.mrf.mxu3 }
 0x256   : > { %v1198_v50 = vpack.c.bf16 %v1161_v49, %v1161_v49  ;;  %v1293_v51 = vsel %vm1277_vm12, %v1197_v43, %v1261_v47 }
 0x257   : > { %v1326_v53 = vunpack.c.l.b16 %v1293_v51 }
 0x258   : > { %v1214_v54 = vunpack.c.l.bf16 %v1198_v50 }
 0x259   : > { %v1991_v55 = vpack.c.b16 %v1326_v53, %v1325_v52 }
 0x25a   : > { %v1246_v56 = vmul.f32 0.20019531, %v1214_v54  ;;  %vm1230_vm13 = vcmp.gt.f32.partialorder %v1214_v54, 0.0 }
 0x25b   : > { %vm1278_vm15 = vmpackc.low %vm1230_vm13, %vm1230_vm13 }
 0x25c   : > { %v1262_v59 = vpack.c.bf16 %v1246_v56, %v1246_v56 }
 0x25d   : > { %v1163_v57 = vpop.f32.mrf.mxu3 }
 0x25e   : > { %v1199_v58 = vpack.c.bf16 %v1163_v57, %v1163_v57  ;;  %v1294_v63 = vsel %vm1278_vm15, %v1198_v50, %v1262_v59 }
 0x25f   : > { %v1327_v3 = vunpack.c.l.b16 %v1294_v63 }
 0x260   : > { %v1215_v60 = vunpack.c.l.bf16 %v1199_v58 }
 0x262   : > { %vm1231_vm14 = vcmp.gt.f32.partialorder %v1215_v60, 0.0  ;;  %v1247_v61 = vmul.f32 0.20019531, %v1215_v60 }
 0x263   : > { %vm1279_vm1 = vmpackc.low %vm1231_vm14, %vm1231_vm14 }
 0x264   : > { %v1263_v62 = vpack.c.bf16 %v1247_v61, %v1247_v61 }
 0x265   : > { %v1166_v0 = vpop.f32.mrf.mxu3 }
 0x266   : > { %v1200_v1 = vpack.c.bf16 %v1166_v0, %v1166_v0  ;;  %v1295_v2 = vsel %vm1279_vm1, %v1199_v58, %v1263_v62 }
 0x267   : > { %v1328_v4 = vunpack.c.l.b16 %v1295_v2 }
 0x268   : > { %v1216_v5 = vunpack.c.l.bf16 %v1200_v1 }
 0x269   : > { %v1993_v6 = vpack.c.b16 %v1328_v4, %v1327_v3 }
 0x26a   : > { %v1248_v7 = vmul.f32 0.20019531, %v1216_v5  ;;  %vm1232_vm2 = vcmp.gt.f32.partialorder %v1216_v5, 0.0 }
 0x26b   : > { %vm1280_vm0 = vmpackc.low %vm1232_vm2, %vm1232_vm2 }
 0x26c   : > { %v1264_v10 = vpack.c.bf16 %v1248_v7, %v1248_v7 }
 0x26d   : > { %v1168_v8 = vpop.f32.mrf.mxu3 }
 0x26e   : > { %v1201_v9 = vpack.c.bf16 %v1168_v8, %v1168_v8  ;;  %v1296_v14 = vsel %vm1280_vm0, %v1200_v1, %v1264_v10 }
 0x26f   : > { %v1329_v18 = vunpack.c.l.b16 %v1296_v14 }
 0x270   : > { %v1217_v11 = vunpack.c.l.bf16 %v1201_v9 }
 0x272   : > { %vm1233_vm3 = vcmp.gt.f32.partialorder %v1217_v11, 0.0  ;;  %v1249_v12 = vmul.f32 0.20019531, %v1217_v11 }
 0x273   : > { %vm1281_vm4 = vmpackc.low %vm1233_vm3, %vm1233_vm3 }
 0x274   : > { %v1265_v13 = vpack.c.bf16 %v1249_v12, %v1249_v12 }
 0x275   : > { %v1171_v15 = vpop.f32.mrf.mxu3 }
 0x276   : > { %v1202_v16 = vpack.c.bf16 %v1171_v15, %v1171_v15  ;;  %v1297_v17 = vsel %vm1281_vm4, %v1201_v9, %v1265_v13 }
 0x277   : > { %v1330_v19 = vunpack.c.l.b16 %v1297_v17 }
 0x278   : > { %v1218_v20 = vunpack.c.l.bf16 %v1202_v16 }
 0x279   : > { %v1995_v21 = vpack.c.b16 %v1330_v19, %v1329_v18 }
 0x27a   : > { %v1250_v22 = vmul.f32 0.20019531, %v1218_v20  ;;  %vm1234_vm5 = vcmp.gt.f32.partialorder %v1218_v20, 0.0 }
 0x27b   : > { %vm1282_vm7 = vmpackc.low %vm1234_vm5, %vm1234_vm5 }
 0x27c   : > { %v1266_v25 = vpack.c.bf16 %v1250_v22, %v1250_v22 }
 0x27d   : > { %v1173_v23 = vpop.f32.mrf.mxu3 }
 0x27e   : > { %v1203_v24 = vpack.c.bf16 %v1173_v23, %v1173_v23  ;;  %v1298_v29 = vsel %vm1282_vm7, %v1202_v16, %v1266_v25 }
 0x27f   : > { %v1331_v33 = vunpack.c.l.b16 %v1298_v29 }
 0x280   : > { %v1219_v26 = vunpack.c.l.bf16 %v1203_v24 }
 0x282   : > { %vm1235_vm6 = vcmp.gt.f32.partialorder %v1219_v26, 0.0  ;;  %v1251_v27 = vmul.f32 0.20019531, %v1219_v26 }
 0x283   : > { %vm1283_vm8 = vmpackc.low %vm1235_vm6, %vm1235_vm6 }
 0x284   : > { %v1267_v28 = vpack.c.bf16 %v1251_v27, %v1251_v27 }
 0x285   : > { %v1176_v30 = vpop.f32.mrf.mxu3 }
 0x286   : > { %v1204_v31 = vpack.c.bf16 %v1176_v30, %v1176_v30  ;;  %v1299_v32 = vsel %vm1283_vm8, %v1203_v24, %v1267_v28 }
 0x287   : > { %v1332_v34 = vunpack.c.l.b16 %v1299_v32 }
 0x288   : > { %v1220_v35 = vunpack.c.l.bf16 %v1204_v31 }
 0x289   : > { %v1997_v36 = vpack.c.b16 %v1332_v34, %v1331_v33  ;;  %v1308_v33 = vld [vmem:[%s2044_s6] sm:$0xf] }
 0x28a   : > { %v1252_v37 = vmul.f32 0.20019531, %v1220_v35  ;;  %vm1236_vm9 = vcmp.gt.f32.partialorder %v1220_v35, 0.0 }
 0x28b   : > { %vm1284_vm11 = vmpackc.low %vm1236_vm9, %vm1236_vm9 }
 0x28c   : > { %v1268_v40 = vpack.c.bf16 %v1252_v37, %v1252_v37 }
 0x28d   : > { %v1178_v38 = vpop.f32.mrf.mxu3 }
 0x28e   : > { %v1205_v39 = vpack.c.bf16 %v1178_v38, %v1178_v38  ;;  %v1300_v44 = vsel %vm1284_vm11, %v1204_v31, %v1268_v40 }
 0x28f   : > { %v1333_v47 = vunpack.c.l.b16 %v1300_v44 }
 0x290   : > { %v1221_v41 = vunpack.c.l.bf16 %v1205_v39 }
 0x292   : > { %vm1237_vm10 = vcmp.gt.f32.partialorder %v1221_v41, 0.0  ;;  %v1253_v42 = vmul.f32 0.20019531, %v1221_v41 }
 0x293   : > { %vm1285_vm12 = vmpackc.low %vm1237_vm10, %vm1237_vm10 }
 0x294   : > { %v1269_v43 = vpack.c.bf16 %v1253_v42, %v1253_v42 }
 0x295   : > { %v1181_v45 = vpop.f32.mrf.mxu3 }
 0x296   : > { %v1301_v46 = vsel %vm1285_vm12, %v1205_v39, %v1269_v43  ;;  %v1206_v5 = vpack.c.bf16 %v1181_v45, %v1181_v45 }
 0x297   : > { %v1334_v48 = vunpack.c.l.b16 %v1301_v46 }
 0x298   : > { %v1222_v15 = vunpack.c.l.bf16 %v1206_v5 }
 0x299   : > { %v1345_v49 = vpack.c.b16 %v1334_v48, %v1333_v47 }
 0x29a   : > { %v1254_v20 = vmul.f32 0.20019531, %v1222_v15  ;;  %vm1238_vm6 = vcmp.gt.f32.partialorder %v1222_v15, 0.0 }
 0x29b   : > { %vm1286_vm8 = vmpackc.low %vm1238_vm6, %vm1238_vm6 }
 0x29c   : > { %v1270_v26 = vpack.c.bf16 %v1254_v20, %v1254_v20 }
 0x29d   : > { %v1183_v50 = vpop.f32.mrf.mxu3 }
 0x29e   : > { %v1207_v2 = vpack.c.bf16 %v1183_v50, %v1183_v50  ;;  %v1302_v29 = vsel %vm1286_vm8, %v1206_v5, %v1270_v26 }
 0x29f   : > { %v1335_v31 = vunpack.c.l.b16 %v1302_v29 }
 0x2a0   : > { %v1223_v10 = vunpack.c.l.bf16 %v1207_v2 }
 0x2a2   : > { %v1255_v18 = vmul.f32 0.20019531, %v1223_v10  ;;  %vm1239_vm5 = vcmp.gt.f32.partialorder %v1223_v10, 0.0 }
 0x2a3   : > { %vm1287_vm7 = vmpackc.low %vm1239_vm5, %vm1239_vm5 }
 0x2a4   : > { %v1271_v24 = vpack.c.bf16 %v1255_v18, %v1255_v18 }
 0x2a5   : > { %v1186_v51 = vpop.f32.mrf.mxu3 }
 0x2a6   : > { %v1208_v58 = vpack.c.bf16 %v1186_v51, %v1186_v51  ;;  %v1303_v28 = vsel %vm1287_vm7, %v1207_v2, %v1271_v24 }
 0x2a7   : > { %v1336_v30 = vunpack.c.l.b16 %v1303_v28 }
 0x2a8   : > { %v1224_v63 = vunpack.c.l.bf16 %v1208_v58 }
 0x2a9   : > { %v1346_v32 = vpack.c.b16 %v1336_v30, %v1335_v31 }
 0x2aa   : > { %v1256_v7 = vmul.f32 0.20019531, %v1224_v63  ;;  %vm1240_vm3 = vcmp.gt.f32.partialorder %v1224_v63, 0.0 }
 0x2ab   : > { %vm1288_vm4 = vmpackc.low %vm1240_vm3, %vm1240_vm3 }
 0x2ac   : > { %v1272_v16 = vpack.c.bf16 %v1256_v7, %v1256_v7 }
 0x2ad   : > { %v1188_v52 = vpop.f32.mrf.mxu3 }
 0x2ae   : > { %v1209_v57 = vpack.c.bf16 %v1188_v52, %v1188_v52  ;;  %v1304_v22 = vsel %vm1288_vm4, %v1208_v58, %v1272_v16 }
 0x2af   : > { %v1337_v25 = vunpack.c.l.b16 %v1304_v22 }
 0x2b0   : > { %v1225_v61 = vunpack.c.l.bf16 %v1209_v57 }
 0x2b2   : > { %v1257_v3 = vmul.f32 0.20019531, %v1225_v61  ;;  %vm1241_vm2 = vcmp.gt.f32.partialorder %v1225_v61, 0.0 }
 0x2b3   : > { %vm1289_vm0 = vmpackc.low %vm1241_vm2, %vm1241_vm2 }
 0x2b4   : > { %v1273_v11 = vpack.c.bf16 %v1257_v3, %v1257_v3 }
 0x2b5   : > { %v1191_v53 = vpop.f32.mrf.mxu3 }
 0x2b6   : > { %v1210_v54 = vpack.c.bf16 %v1191_v53, %v1191_v53  ;;  %v1305_v19 = vsel %vm1289_vm0, %v1209_v57, %v1273_v11 }
 0x2b7   : > { %v1338_v23 = vunpack.c.l.b16 %v1305_v19 }
 0x2b8   : > { %v1226_v56 = vunpack.c.l.bf16 %v1210_v54 }
 0x2b9   : > { %v1347_v27 = vpack.c.b16 %v1338_v23, %v1337_v25 }
 0x2ba   : > { %v1258_v59 = vmul.f32 0.20019531, %v1226_v56  ;;  %vm1242_vm13 = vcmp.gt.f32.partialorder %v1226_v56, 0.0 }
 0x2bb   : > { %vm1290_vm15 = vmpackc.low %vm1242_vm13, %vm1242_vm13 }
 0x2bc   : > { %v1274_v0 = vpack.c.bf16 %v1258_v59, %v1258_v59 }
 0x2bd   : > { %v1193_v60 = vpop.f32.mrf.mxu3 }
 0x2be   : > { %v1211_v62 = vpack.c.bf16 %v1193_v60, %v1193_v60  ;;  %v1306_v9 = vsel %vm1290_vm15, %v1210_v54, %v1274_v0 }
 0x2bf   : > { %v1339_v13 = vunpack.c.l.b16 %v1306_v9 }
 0x2c0   : > { %v1227_v1 = vunpack.c.l.bf16 %v1211_v62 }
 0x2c2   : > { %vm1243_vm14 = vcmp.gt.f32.partialorder %v1227_v1, 0.0  ;;  %v1259_v4 = vmul.f32 0.20019531, %v1227_v1 }
 0x2c3   : > { %vm1291_vm1 = vmpackc.low %vm1243_vm14, %vm1243_vm14 }
 0x2c4   : > { %v1275_v8 = vpack.c.bf16 %v1259_v4, %v1259_v4 }
 0x2c6   : > { %v1307_v12 = vsel %vm1291_vm1, %v1211_v62, %v1275_v8 }
 0x2c7   : > { %v1340_v14 = vunpack.c.l.b16 %v1307_v12 }
 0x2c9   : > { %v1348_v17 = vpack.c.b16 %v1340_v14, %v1339_v13 }
 0x2cb   : > { %1357 = vmatpush.bf16.xpose.msrb.mxu1 %v1348_v17 }
 0x2d3   : > { %1358 = vmatpush.bf16.xpose.msrb.mxu1 %v1347_v27 }
 0x2db   : > { %1359 = vmatpush.bf16.xpose.msrb.mxu1 %v1346_v32 }
 0x2e3   : > { %1360 = vmatpush.bf16.xpose.msrb.mxu1 %v1345_v49 }
 0x2eb   : > { %1361 = vmatpush.bf16.xpose.msrb.mxu1 %v1997_v36 }
 0x2f3   : > { %1362 = vmatpush.bf16.xpose.msrb.mxu1 %v1995_v21 }
 0x2fb   : > { %1363 = vmatpush.bf16.xpose.msrb.mxu1 %v1993_v6 }
 0x303   : > { %1364 = vmatpush.bf16.xpose.msrb.mxu1 %v1991_v55 }
 0x30a   : > { %1365 = vmatmul.bf16.vlgmr.msrb.gmra.mxu1 %v1308_v33 }
 0x387   : > { %v1366_v21 = vpop.f32.mrf.mxu1 }
 0x388   : > { %1370 = vst [vmem:[%s287_s9] sm:$0x1] %v1366_v21 }
 0x389   : > { %1702 = shalt.err (!%p1699_p3)
}
 0x38a   : > { %1631 = dma.vmem_to_hbm [thread:$0]  (%p1819_p5), %s1383_s15, 16, %s1385_s13, %s1372_s14  }
 0x38f   : > { %v1368_v55 = vpop.f32.mrf.mxu1 }
 0x390 PF: > { %p1637_p4 = scmp.ge.s32.totalorder %s1737_s27, 2  ;;  %s1396_s22 = sand.u32 1, %s1725_s24  }
 0x391   : > { %s1397_s23 = scalar_lea.sflag [#allocation3], %s1396_s22 }
 0x392   : > { %p1634_p7 = pnand %p1637_p4, %p1823_p6 }
 0x394   : > { %p1635_p8 = pneg %p1634_p7 }
 0x396   : > { %1720 = dma.done.wait (%p1635_p8), %s1397_s23, 16  }
 0x397   : > { %1722 = vsyncadd (%p1635_p8), %s1397_s23, 4294967280  ;;  %p17_p9 = scmp.ge.s32.totalorder %s1806_s30, 4   ;;  %s2048_s24 = smov %s1729_s25 }
 0x398   : > { %s2049_s25 = smov %s1733_s26  ;;  %s2050_s26 = smov %s1817_s10 }
 0x399   : > { %s2051_s27 = smov %s1806_s30  ;;  %19 = sbr.rel (!%p17_p9) target bundleno = 3 (0x3), region = 86 }
 0x39e   :  { %1402 = vsyncpa [#allocation3], 1 }
 0x39f   :  { %1404 = vsyncpa [#allocation3 + $0x1], 1 }

</bundles_post_ra>
